<compile_context>
chip_gen: v5e
topology: v5e:2x2
jax: 0.10.0
libtpu: 0.0.40
codegen_flags: <defaults>
</compile_context>

<pallas_src>
import functools

import jax
import jax.numpy as jnp
from jax.experimental import pallas as pl
from jax.experimental.pallas import tpu as pltpu


def _lenet_kernel(x_ref, w_ref, b_ref, out_ref, *,
                  c_in, kh_sz, stride, h_out, c_out,
                  pool_dims, hp_out, wp_out):
    # x_ref  : (1, Cin, H, W)       native NCHW, one batch element
    # w_ref  : (Cin*KH*W, Ncols)    block-Toeplitz expanded conv weights
    # b_ref  : (1, Ncols)           bias tiled to the output-column layout
    # out_ref: (1, h_res, w_res*Cout)
    if pool_dims is None:
        ph, pw = 1, 1
        h_used = h_out
    else:
        ph, pw = pool_dims
        h_used = hp_out * ph          # floor-mode pool: trailing conv rows skipped

    # ---- implicit im2col: build the (h_used, Cin*KH*W) LHS from static slices.
    pieces = []
    for ci in range(c_in):
        plane = x_ref[0, ci]                                    # (H, W)
        for kh in range(kh_sz):
            if stride == 1:
                pieces.append(plane[kh:kh + h_used, :])
            else:
                pieces.append(
                    plane[kh:kh + (h_used - 1) * stride + 1:stride, :])
    lhs = jnp.concatenate(pieces, axis=-1)                      # (h_used, Cin*KH*W)

    # ---- single MXU matmul + bias + ReLU on the whole slab.
    y = jnp.dot(lhs, w_ref[...], preferred_element_type=jnp.float32)
    y = jnp.maximum(y + b_ref[...], 0.0)                        # (h_used, Ncols)

    if pool_dims is None:
        out = y
    else:
        # ---- max-pool in registers (no VMEM scratch).
        # W-pool: columns are ordered (pj, w0p, co) -> max of pw contiguous
        #         lane blocks of width wp_out*Cout.
        wc = wp_out * c_out
        yw = y[:, :wc]
        for pj in range(1, pw):
            yw = jnp.maximum(yw, y[:, pj * wc:(pj + 1) * wc])
        # H-pool: max over ph adjacent rows per pooled output row.
        rows = []
        for hp in range(hp_out):
            r = yw[hp * ph:hp * ph + 1, :]
            for pi in range(1, ph):
                r = jnp.maximum(r, yw[hp * ph + pi:hp * ph + pi + 1, :])
            rows.append(r)
        out = jnp.concatenate(rows, axis=0) if hp_out > 1 else rows[0]

    out_ref[0] = out.astype(out_ref.dtype)                      # one lane-dense store


def _toeplitz_weight(weight_oihw, *, w_in, stride, w_used, pool_w):
    """Expand OIHW conv weights into the (Cin*KH*W, Ncols) block-Toeplitz matrix."""
    c_out, c_in, kh_sz, kw_sz = weight_oihw.shape
    kw_ar = jnp.arange(kw_sz)[:, None, None]
    w_ar = jnp.arange(w_in)[None, :, None]
    w0_ar = jnp.arange(w_used)[None, None, :]
    sel = (w_ar == w0_ar * stride + kw_ar).astype(weight_oihw.dtype)   # (KW, W, w_used)
    # b5[ci, kh, w, w0, co] = weight[co, ci, kh, w - w0*stride] (0 when out of range)
    b5 = jnp.einsum('oihk,kwv->ihwvo', weight_oihw, sel)
    if pool_w is None:
        return b5.reshape(c_in * kh_sz * w_in, w_used * c_out)          # cols (w0, co)
    pw = pool_w
    wp_out = w_used // pw
    b6 = b5.reshape(c_in, kh_sz, w_in, wp_out, pw, c_out)
    b6 = b6.transpose(0, 1, 2, 4, 3, 5)                                 # (..., pj, w0p, co)
    return b6.reshape(c_in * kh_sz * w_in, pw * wp_out * c_out)


def lenet_layer(x_nchw, weight_oihw, bias, *, stride=1, pool_dims=None):
    """Pallas equivalent of LeNetLayer.forward (NCHW in, NCHW out)."""
    n, c_in, h_in, w_in = x_nchw.shape
    c_out, c_in_w, kh_sz, kw_sz = weight_oihw.shape
    assert c_in_w == c_in
    h_out = (h_in - kh_sz) // stride + 1
    w_out = (w_in - kw_sz) // stride + 1

    if pool_dims is not None:
        if isinstance(pool_dims, int):
            pool_dims = (pool_dims, pool_dims)
        ph, pw = pool_dims
        hp_out, wp_out = h_out // ph, w_out // pw   # torch max_pool2d: stride=kernel, floor
        h_res, w_res = hp_out, wp_out
        w_used = wp_out * pw
        pool_w = pw
    else:
        hp_out, wp_out = h_out, w_out
        h_res, w_res = h_out, w_out
        w_used = w_out
        pool_w = None

    wt = _toeplitz_weight(weight_oihw, w_in=w_in, stride=stride,
                          w_used=w_used, pool_w=pool_w)                 # (K, Ncols)
    k_dim, n_cols = wt.shape
    b_cols = jnp.tile(bias, n_cols // c_out).reshape(1, n_cols)

    kernel = functools.partial(
        _lenet_kernel, c_in=c_in, kh_sz=kh_sz, stride=stride, h_out=h_out,
        c_out=c_out, pool_dims=pool_dims, hp_out=hp_out, wp_out=wp_out)

    out2 = pl.pallas_call(
        kernel,
        out_shape=jax.ShapeDtypeStruct((n, h_res, w_res * c_out), x_nchw.dtype),
        grid_spec=pltpu.PrefetchScalarGridSpec(
            num_scalar_prefetch=0,
            grid=(n,),
            in_specs=[
                pl.BlockSpec((1, c_in, h_in, w_in), lambda i: (i, 0, 0, 0)),
                pl.BlockSpec((k_dim, n_cols), lambda i: (0, 0)),
                pl.BlockSpec((1, n_cols), lambda i: (0, 0)),
            ],
            out_specs=pl.BlockSpec((1, h_res, w_res * c_out),
                                   lambda i: (i, 0, 0)),
        ),
        compiler_params=pltpu.CompilerParams(
            dimension_semantics=("parallel",)),
    )(x_nchw, wt, b_cols)

    # (N, h_res, w_res*Cout) -> NCHW (tiny output; single cheap transpose).
    return out2.reshape(n, h_res, w_res, c_out).transpose(0, 3, 1, 2)


def lenet_layer_ref(x, weight, bias, *, stride=1, pool_dims=None):
    """Pure-JAX reference matching torch semantics."""
    y = jax.lax.conv_general_dilated(
        x, weight, window_strides=(stride, stride), padding="VALID",
        dimension_numbers=("NCHW", "OIHW", "NCHW"))
    y = y + bias.reshape(1, -1, 1, 1)
    y = jnp.maximum(y, 0.0)
    if pool_dims is not None:
        if isinstance(pool_dims, int):
            pool_dims = (pool_dims, pool_dims)
        ph, pw = pool_dims
        y = jax.lax.reduce_window(y, -jnp.inf, jax.lax.max,
                                  (1, 1, ph, pw), (1, 1, ph, pw), "VALID")
    return y


if __name__ == "__main__":
    # Module config: LeNetLayer(in_channels=4, out_channels=8, kernel_size=3,
    #                           stride=1, pool_dims=(2, 2))
    N, C_IN, H, W = 2, 4, 16, 16
    C_OUT, K, STRIDE = 8, 3, 1
    POOL = (2, 2)

    key = jax.random.PRNGKey(0)
    kx, kw_, kb = jax.random.split(key, 3)

    x = jax.random.normal(kx, (N, C_IN, H, W), dtype=jnp.float32)

    # Deterministic param init mimicking torch.nn.Conv2d defaults
    # (uniform in [-1/sqrt(fan_in), 1/sqrt(fan_in)]).
    fan_in = C_IN * K * K
    bound = 1.0 / (fan_in ** 0.5)
    weight = jax.random.uniform(kw_, (C_OUT, C_IN, K, K),
                                minval=-bound, maxval=bound, dtype=jnp.float32)
    bias = jax.random.uniform(kb, (C_OUT,),
                              minval=-bound, maxval=bound, dtype=jnp.float32)

    # Pooling path (matches the module config).
    out = lenet_layer(x, weight, bias, stride=STRIDE, pool_dims=POOL)
    out = jax.block_until_ready(out)
    ref = lenet_layer_ref(x, weight, bias, stride=STRIDE, pool_dims=POOL)
    assert out.shape == (N, C_OUT, (H - K + 1) // POOL[0], (W - K + 1) // POOL[1])
    assert jnp.allclose(out, ref, atol=1e-5, rtol=1e-5), "mismatch vs JAX reference (pool)"

    # No-pool path (pool_dims=None branch of the module).
    out_np = lenet_layer(x, weight, bias, stride=STRIDE, pool_dims=None)
    out_np = jax.block_until_ready(out_np)
    ref_np = lenet_layer_ref(x, weight, bias, stride=STRIDE, pool_dims=None)
    assert out_np.shape == (N, C_OUT, H - K + 1, W - K + 1)
    assert jnp.allclose(out_np, ref_np, atol=1e-5, rtol=1e-5), "mismatch vs JAX reference (no pool)"

    print("KERNEL_OK")
</pallas_src>

<mosaic_0001>
module attributes {stable_mosaic.version = 11 : i64} {
  func.func @_lenet_kernel(%arg0: i32, %arg1: memref<1x4x16x16xf32, #tpu.memory_space<vmem>>, %arg2: memref<192x112xf32, #tpu.memory_space<vmem>>, %arg3: memref<1x112xf32, #tpu.memory_space<vmem>>, %arg4: memref<1x7x56xf32, #tpu.memory_space<vmem>>) attributes {dimension_semantics = [#tpu.dimension_semantics<parallel>], iteration_bounds = array<i64: 2>, scalar_prefetch = 0 : i64, scratch_operands = 0 : i64, tpu.core_type = #tpu.core_type<tc>, window_params = [{transform_indices = @transform_0, window_bounds = array<i64: 1, 4, 16, 16>}, {pipeline_mode = #tpu.pipeline_mode<synchronous>, transform_indices = @transform_1, window_bounds = array<i64: 192, 112>}, {pipeline_mode = #tpu.pipeline_mode<synchronous>, transform_indices = @transform_2, window_bounds = array<i64: 1, 112>}, {transform_indices = @transform_3, window_bounds = array<i64: 1, 7, 56>}]} {
    %c0 = arith.constant 0 : index
    %c0_0 = arith.constant 0 : index
    %c0_1 = arith.constant 0 : index
    %c0_2 = arith.constant 0 : index
    %0 = vector.load %arg1[%c0, %c0_0, %c0_1, %c0_2] : memref<1x4x16x16xf32, #tpu.memory_space<vmem>>, vector<1x1x16x16xf32>
    %1 = vector.shape_cast %0 : vector<1x1x16x16xf32> to vector<16x16xf32>
    %2 = vector.extract_strided_slice %1 {offsets = [0, 0], sizes = [14, 16], strides = [1, 1]} : vector<16x16xf32> to vector<14x16xf32>
    %3 = vector.extract_strided_slice %1 {offsets = [1, 0], sizes = [14, 16], strides = [1, 1]} : vector<16x16xf32> to vector<14x16xf32>
    %4 = vector.extract_strided_slice %1 {offsets = [2, 0], sizes = [14, 16], strides = [1, 1]} : vector<16x16xf32> to vector<14x16xf32>
    %c0_3 = arith.constant 0 : index
    %c1 = arith.constant 1 : index
    %c0_4 = arith.constant 0 : index
    %c0_5 = arith.constant 0 : index
    %5 = vector.load %arg1[%c0_3, %c1, %c0_4, %c0_5] : memref<1x4x16x16xf32, #tpu.memory_space<vmem>>, vector<1x1x16x16xf32>
    %6 = vector.shape_cast %5 : vector<1x1x16x16xf32> to vector<16x16xf32>
    %7 = vector.extract_strided_slice %6 {offsets = [0, 0], sizes = [14, 16], strides = [1, 1]} : vector<16x16xf32> to vector<14x16xf32>
    %8 = vector.extract_strided_slice %6 {offsets = [1, 0], sizes = [14, 16], strides = [1, 1]} : vector<16x16xf32> to vector<14x16xf32>
    %9 = vector.extract_strided_slice %6 {offsets = [2, 0], sizes = [14, 16], strides = [1, 1]} : vector<16x16xf32> to vector<14x16xf32>
    %c0_6 = arith.constant 0 : index
    %c2 = arith.constant 2 : index
    %c0_7 = arith.constant 0 : index
    %c0_8 = arith.constant 0 : index
    %10 = vector.load %arg1[%c0_6, %c2, %c0_7, %c0_8] : memref<1x4x16x16xf32, #tpu.memory_space<vmem>>, vector<1x1x16x16xf32>
    %11 = vector.shape_cast %10 : vector<1x1x16x16xf32> to vector<16x16xf32>
    %12 = vector.extract_strided_slice %11 {offsets = [0, 0], sizes = [14, 16], strides = [1, 1]} : vector<16x16xf32> to vector<14x16xf32>
    %13 = vector.extract_strided_slice %11 {offsets = [1, 0], sizes = [14, 16], strides = [1, 1]} : vector<16x16xf32> to vector<14x16xf32>
    %14 = vector.extract_strided_slice %11 {offsets = [2, 0], sizes = [14, 16], strides = [1, 1]} : vector<16x16xf32> to vector<14x16xf32>
    %c0_9 = arith.constant 0 : index
    %c3 = arith.constant 3 : index
    %c0_10 = arith.constant 0 : index
    %c0_11 = arith.constant 0 : index
    %15 = vector.load %arg1[%c0_9, %c3, %c0_10, %c0_11] : memref<1x4x16x16xf32, #tpu.memory_space<vmem>>, vector<1x1x16x16xf32>
    %16 = vector.shape_cast %15 : vector<1x1x16x16xf32> to vector<16x16xf32>
    %17 = vector.extract_strided_slice %16 {offsets = [0, 0], sizes = [14, 16], strides = [1, 1]} : vector<16x16xf32> to vector<14x16xf32>
    %18 = vector.extract_strided_slice %16 {offsets = [1, 0], sizes = [14, 16], strides = [1, 1]} : vector<16x16xf32> to vector<14x16xf32>
    %19 = vector.extract_strided_slice %16 {offsets = [2, 0], sizes = [14, 16], strides = [1, 1]} : vector<16x16xf32> to vector<14x16xf32>
    %20 = tpu.concatenate %2, %3, %4, %7, %8, %9, %12, %13, %14, %17, %18, %19 in 1 : vector<14x16xf32>, vector<14x16xf32>, vector<14x16xf32>, vector<14x16xf32>, vector<14x16xf32>, vector<14x16xf32>, vector<14x16xf32>, vector<14x16xf32>, vector<14x16xf32>, vector<14x16xf32>, vector<14x16xf32>, vector<14x16xf32> -> vector<14x192xf32>
    %c0_12 = arith.constant 0 : index
    %c0_13 = arith.constant 0 : index
    %21 = vector.load %arg2[%c0_12, %c0_13] : memref<192x112xf32, #tpu.memory_space<vmem>>, vector<192x112xf32>
    %cst = arith.constant dense<0.000000e+00> : vector<14x112xf32>
    %22 = tpu.matmul %20, %21, %cst {dimension_numbers = #tpu.dot_dimension_numbers<[1], [0], [0], [1], [0, 0, 1, 1], [], []>} : vector<14x192xf32>, vector<192x112xf32>, vector<14x112xf32> -> vector<14x112xf32>
    %c0_14 = arith.constant 0 : index
    %c0_15 = arith.constant 0 : index
    %23 = vector.load %arg3[%c0_14, %c0_15] : memref<1x112xf32, #tpu.memory_space<vmem>>, vector<1x112xf32>
    %24 = vector.broadcast %23 : vector<1x112xf32> to vector<14x112xf32>
    %25 = arith.addf %22, %24 : vector<14x112xf32>
    %cst_16 = arith.constant 0.000000e+00 : f32
    %26 = vector.broadcast %cst_16 : f32 to vector<14x112xf32>
    %27 = arith.maximumf %25, %26 : vector<14x112xf32>
    %28 = vector.extract_strided_slice %27 {offsets = [0, 0], sizes = [14, 56], strides = [1, 1]} : vector<14x112xf32> to vector<14x56xf32>
    %29 = vector.extract_strided_slice %27 {offsets = [0, 56], sizes = [14, 56], strides = [1, 1]} : vector<14x112xf32> to vector<14x56xf32>
    %30 = arith.maximumf %28, %29 : vector<14x56xf32>
    %31 = vector.extract_strided_slice %30 {offsets = [0, 0], sizes = [1, 56], strides = [1, 1]} : vector<14x56xf32> to vector<1x56xf32>
    %32 = vector.extract_strided_slice %30 {offsets = [1, 0], sizes = [1, 56], strides = [1, 1]} : vector<14x56xf32> to vector<1x56xf32>
    %33 = arith.maximumf %31, %32 : vector<1x56xf32>
    %34 = vector.extract_strided_slice %30 {offsets = [2, 0], sizes = [1, 56], strides = [1, 1]} : vector<14x56xf32> to vector<1x56xf32>
    %35 = vector.extract_strided_slice %30 {offsets = [3, 0], sizes = [1, 56], strides = [1, 1]} : vector<14x56xf32> to vector<1x56xf32>
    %36 = arith.maximumf %34, %35 : vector<1x56xf32>
    %37 = vector.extract_strided_slice %30 {offsets = [4, 0], sizes = [1, 56], strides = [1, 1]} : vector<14x56xf32> to vector<1x56xf32>
    %38 = vector.extract_strided_slice %30 {offsets = [5, 0], sizes = [1, 56], strides = [1, 1]} : vector<14x56xf32> to vector<1x56xf32>
    %39 = arith.maximumf %37, %38 : vector<1x56xf32>
    %40 = vector.extract_strided_slice %30 {offsets = [6, 0], sizes = [1, 56], strides = [1, 1]} : vector<14x56xf32> to vector<1x56xf32>
    %41 = vector.extract_strided_slice %30 {offsets = [7, 0], sizes = [1, 56], strides = [1, 1]} : vector<14x56xf32> to vector<1x56xf32>
    %42 = arith.maximumf %40, %41 : vector<1x56xf32>
    %43 = vector.extract_strided_slice %30 {offsets = [8, 0], sizes = [1, 56], strides = [1, 1]} : vector<14x56xf32> to vector<1x56xf32>
    %44 = vector.extract_strided_slice %30 {offsets = [9, 0], sizes = [1, 56], strides = [1, 1]} : vector<14x56xf32> to vector<1x56xf32>
    %45 = arith.maximumf %43, %44 : vector<1x56xf32>
    %46 = vector.extract_strided_slice %30 {offsets = [10, 0], sizes = [1, 56], strides = [1, 1]} : vector<14x56xf32> to vector<1x56xf32>
    %47 = vector.extract_strided_slice %30 {offsets = [11, 0], sizes = [1, 56], strides = [1, 1]} : vector<14x56xf32> to vector<1x56xf32>
    %48 = arith.maximumf %46, %47 : vector<1x56xf32>
    %49 = vector.extract_strided_slice %30 {offsets = [12, 0], sizes = [1, 56], strides = [1, 1]} : vector<14x56xf32> to vector<1x56xf32>
    %50 = vector.extract_strided_slice %30 {offsets = [13, 0], sizes = [1, 56], strides = [1, 1]} : vector<14x56xf32> to vector<1x56xf32>
    %51 = arith.maximumf %49, %50 : vector<1x56xf32>
    %52 = tpu.concatenate %33, %36, %39, %42, %45, %48, %51 in 0 : vector<1x56xf32>, vector<1x56xf32>, vector<1x56xf32>, vector<1x56xf32>, vector<1x56xf32>, vector<1x56xf32>, vector<1x56xf32> -> vector<7x56xf32>
    %c0_17 = arith.constant 0 : index
    %c0_18 = arith.constant 0 : index
    %c0_19 = arith.constant 0 : index
    %53 = vector.load %arg4[%c0_17, %c0_18, %c0_19] : memref<1x7x56xf32, #tpu.memory_space<vmem>>, vector<1x7x56xf32>
    %54 = vector.shape_cast %53 : vector<1x7x56xf32> to vector<7x56xf32>
    %55 = vector.shape_cast %52 : vector<7x56xf32> to vector<1x7x56xf32>
    tpu.vector_store %arg4[%c0_17, %c0_18, %c0_19], %55 {strides = array<i32>} : memref<1x7x56xf32, #tpu.memory_space<vmem>>, vector<1x7x56xf32>,
    return
  }
  func.func @transform_0(%arg0: i32) -> (i32, i32, i32, i32) {
    %c0_i32 = arith.constant 0 : i32
    %c0_i32_0 = arith.constant 0 : i32
    %c0_i32_1 = arith.constant 0 : i32
    %c0_i32_2 = arith.constant 0 : i32
    return %arg0, %c0_i32, %c0_i32_0, %c0_i32_1 : i32, i32, i32, i32
  }
  func.func @transform_1(%arg0: i32) -> (i32, i32) {
    %c0_i32 = arith.constant 0 : i32
    %c0_i32_0 = arith.constant 0 : i32
    %c0_i32_1 = arith.constant 0 : i32
    return %c0_i32, %c0_i32_0 : i32, i32
  }
  func.func @transform_2(%arg0: i32) -> (i32, i32) {
    %c0_i32 = arith.constant 0 : i32
    %c0_i32_0 = arith.constant 0 : i32
    %c0_i32_1 = arith.constant 0 : i32
    return %c0_i32, %c0_i32_0 : i32, i32
  }
  func.func @transform_3(%arg0: i32) -> (i32, i32, i32) {
    %c0_i32 = arith.constant 0 : i32
    %c0_i32_0 = arith.constant 0 : i32
    %c0_i32_1 = arith.constant 0 : i32
    return %arg0, %c0_i32, %c0_i32_0 : i32, i32, i32
  }
}

</mosaic_0001>

<bundles_post_ra>
// kernel: tpu_custom_call.1
= control target key start
LH: loop header
LB: loop body
LE: loop exit
PB: predicated region body
PF: predicated region fallthrough
CT: control target
= control target key end

     0   :  { %8 = vsyncpa [#allocation3], 0  ;;  %s982_s0 = inlined_call_operand.hbm [shape: f32[2,4,16,16], index: 0, kind: input, shape index: {}]   ;;  %s983_s1 = inlined_call_operand.hbm [shape: f32[192,112], index: 1, kind: input, shape index: {}]   ;;  %s984_s2 = inlined_call_operand.vmem [shape: f32[1,112], index: 2, kind: input, shape index: {}]   ;;  %s985_s3 = inlined_call_operand.vmem [shape: f32[2,7,56], index: 3, kind: output, shape index: {}]  }
   0x1   :  { %10 = vsyncpa [#allocation3 + $0x1], 0 }
   0x2   :  { %11 = vsyncpa [#allocation5], 0  ;;  %s809_s12 = smov 0   ;;  %s811_s13 = smov 0  }
   0x3   :  { %s813_s14 = smov 0   ;;  %s815_s15 = smov 0  }
   0x4 LB: > { %s828_s16 = sadd.s32 4294967295, %s776_s15   ;;  %p37_p0 = scmp.ne.s32.totalorder %s768_s13, %s764_s12  ;;  %s776_s15 = sphi %s815_s15, %s992_s15   ;;  %s772_s14 = sphi %s813_s14, %s991_s14   ;;  %s768_s13 = sphi %s811_s13, %s990_s13   ;;  %s764_s12 = sphi %s809_s12, %s989_s12  }
   0x5   : > { %p38_p1 = scmp.eq.s32.totalorder %s828_s16, 0  ;;  %p545_p2 = scmp.ge.s32.totalorder %s776_s15, 1 }
   0x6   : > { %p116_p3 = scmp.lt.s32.totalorder %s776_s15, 3  ;;  %s127_s20 = sshll.u32 %s983_s1, 4  ;;  %s128_s20 = int_to_ptr.hbm [resolvable:$true] %s127_s20 }
   0x7   : > { %p836_p4 = por %p38_p1, %p37_p0  ;;  %s778_s22 = smov [#allocation4]  }
   0x8   : > { %p843_p5 = pnand %p545_p2, %p116_p3  ;;  %s129_s23 = sshll.u32 %s778_s22, 4  ;;  %s130_s23 = int_to_ptr.vmem [resolvable:$true] %s129_s23 }
   0x9   : > { %s852_s24 = sadd.s32 1, %s776_s15   ;;  %s779_s25 = smov 128  }
   0xa   : > { %p588_p6 = pneg %p843_p5  ;;  %s780_s26 = smov 8  }
   0xb   : > { %s21_s27 = ssub.s32 %s776_s15, %s852_s24  ;;  %s24_s28 = sadd.s32 1, %s772_s14 }
   0xc   : > { %p589_p7 = pnand %p588_p6, %p38_p1  ;;  %p22_p8 = scmp.eq.s32.totalorder %s21_s27, 0 }
   0xd   : > { %p31_p9 = scmp.ne.s32.totalorder %s772_s14, %s768_s13  ;;  %p32_p10 = scmp.eq.s32.totalorder %s776_s15, 0 }
   0xe   : > { %591 = dma.hbm_to_vmem [thread:$0]  (!%p589_p7), %s128_s20, 3072, %s130_s23, [#allocation5], %s779_s25, %s779_s25, %s780_s26  }
   0xf   : > { %p597_p11 = scmp.lt.s32.totalorder %s776_s15, 2  ;;  %p33_p12 = por %p32_p10, %p31_p9 }
  0x10   : > { %s865_s29 = scalar_select %p22_p8, %s772_s14, %s24_s28  }
  0x11   : > { %s146_s30 = sand.u32 1, %s772_s14   ;;  %s565_s5 = sshll.u32 %s776_s15, 6 }
  0x12   : > { %s548_s4 = sshll.u32 %s146_s30, 6  ;;  %s155_s8 = scalar_lea.hbm %s982_s0, %s565_s5 }
  0x13   : > { %s150_s9 = scalar_lea.vmem [#allocation2], %s548_s4  ;;  %s156_s11 = sshll.u32 %s155_s8, 4  ;;  %s157_s11 = int_to_ptr.hbm [resolvable:$true] %s156_s11 }
  0x14   : > { %s158_s10 = sshll.u32 %s150_s9, 4  ;;  %p872_p13 = pnand %p597_p11, %p33_p12  ;;  %s159_s10 = int_to_ptr.vmem [resolvable:$true] %s158_s10 }
  0x15   : > { %s147_s18 = scalar_lea.sflag [#allocation3], %s146_s30  ;;  %s708_s19 = sshra.s32 %s157_s11, 4  ;;  %s709_s19 = int_to_ptr.hbm [resolvable:$true] %s708_s19 }
  0x16   : > { %s710_s20 = scalar_lea.hbm %s709_s19, 64  ;;  %p712_p2 = pneg %p872_p13 }
  0x17   : > { %p711_p0 = scmp.ne.s32.totalorder %s709_s19, %s710_s20  ;;  %s715_s23 = scalar_lea.hbm %s982_s0, 128 }
  0x18   : > { %p716_p7 = scmp.lt.s32.totalorder %s709_s19, %s982_s0  ;;  %p717_p8 = scmp.lt.s32.totalorder %s715_s23, %s710_s20 }
  0x19   : > { %p713_p3 = pnand %p712_p2, %p711_p0 }
  0x1a   : > { %p718_p9 = por %p717_p8, %p716_p7 }
  0x1b   : > { %p714_p6 = pneg %p713_p3 }
  0x1d   : > { %p719_p10 = pnand %p718_p9, %p714_p6 }
  0x1f   : > { %722 = shalt.err (!%p719_p10)
}
  0x20   : > { %595 = dma.hbm_to_vmem [thread:$0]  (!%p872_p13), %s157_s11, 1024, %s159_s10, %s147_s18, %s779_s25, %s779_s25, %s780_s26  }
  0x21   : > { %170 = sbr.rel (%p843_p5) target bundleno = 448 (0x1c0), region = 32  ;;  %s172_s30 = sand.u32 (!%p843_p5), 1, %s768_s13  }
  0x22   : > { %s552_s4 = sshll.u32 (!%p843_p5), %s172_s30, 6  ;;  %s173_s5 = scalar_lea.sflag (!%p843_p5), [#allocation3], %s172_s30 }
  0x23   : > { %s892_s6 = scalar_lea.vmem (!%p843_p5), [#allocation2], %s552_s4 }
  0x26   : > { %755 = dma.done.wait (%p836_p4), %s173_s5, 1024  }
  0x27   : > { %757 = vsyncadd (%p836_p4), %s173_s5, 4294966272 }
  0x28   : > { %759 = dma.done.wait (%p38_p1), [#allocation5], 3072  }
  0x29   : > { %761 = vsyncadd (%p38_p1), [#allocation5], 4294964224  ;;  %v555_v0 = vld [vmem:[%s892_s6 + $0x10] sm:$0xff]  ;;  %v556_v1 = vld [vmem:[%s892_s6 + $0x18] sm:$0xff]  ;;  %vm221_vm0 = vcmask 1046528   ;;  %s781_s17 = smov 16  }
  0x2a   : > { %v905_v2 = vld [vmem:[%s892_s6] sm:$0xff]  ;;  %v642_v3 = vpack.i.bf16 %v555_v0, %v556_v1  ;;  %v249_v4 = vrot.slane %v555_v0, 1  ;;  %v908_v5 = vld [vmem:[%s892_s6 + $0x8] sm:$0xff]  ;;  %v559_v7 = vld [vmem:[%s892_s6 + $0x30] sm:$0xff]  ;;  %v250_v9 = vrot.slane %v556_v1, 1  ;;  %s782_s21 = smov 48  }
  0x2b   : > { %v222_v6 = vrot.slane %v905_v2, 1  ;;  %v223_v8 = vrot.slane %v908_v5, 1  ;;  %291 = vrot.lane.b32.xlu2 %v559_v7, %s781_s17  ;;  %v258_v10 = vrot.slane %v555_v0, 2  ;;  %v232_v13 = vrot.slane %v905_v2, 2  ;;  %v920_v16 = vld [vmem:[%s892_s6 + $0x20] sm:$0xff]  ;;  %v924_v19 = vld [vmem:[%s892_s6 + $0x28] sm:$0xff] }
  0x2c   : > { %643 = vrot.lane.b32.xlu1 %v642_v3, %s782_s21  ;;  %v251_v12 = vsel %vm221_vm0, %v249_v4, %v250_v9  ;;  %v233_v14 = vrot.slane %v908_v5, 2  ;;  %vm231_vm1 = vcmask 1045504   ;;  %v259_v17 = vrot.slane %v556_v1, 2  ;;  %v357_v20 = vld [vmem:[#allocation4 + $0x78] sm:$0xff]  ;;  %v356_v21 = vld [vmem:[#allocation4 + $0x70] sm:$0xff]  ;;  %v355_v28 = vld [vmem:[#allocation4 + $0x68] sm:$0xff] }
  0x2d   : > { %v224_v11 = vsel %vm221_vm0, %v222_v6, %v223_v8  ;;  %v662_v18 = vpack.i.bf16 %v251_v12, %v250_v9  ;;  %v275_v23 = vrot.slane %v920_v16, 1  ;;  %v276_v25 = vrot.slane %v924_v19, 1  ;;  %376 = vmatpush.msra.mxu0 %v357_v20  ;;  %566 = vmatpush.msra.mxu2 %v357_v20  ;;  %v560_v26 = vld [vmem:[%s892_s6 + $0x38] sm:$0xff]  ;;  %s783_s25 = smov 64   ;;  %s784_s26 = smov 80   ;;  %v354_v30 = vld [vmem:[#allocation4 + $0x60] sm:$0xff] }
  0x2e   : > { %v647_v15 = vpack.i.bf16 %v224_v11, %v223_v8  ;;  %v234_v22 = vsel %vm231_vm1, %v232_v13, %v233_v14  ;;  %v260_v24 = vsel %vm231_vm1, %v258_v10, %v259_v17  ;;  %v297_v31 = vrot.slane %v559_v7, 1  ;;  %s785_s7 = smov 32   ;;  %s786_s8 = smov 112   ;;  %v353_v40 = vld [vmem:[#allocation4 + $0x58] sm:$0xff]  ;;  %v352_v41 = vld [vmem:[#allocation4 + $0x50] sm:$0xff]  ;;  %v351_v42 = vld [vmem:[#allocation4 + $0x48] sm:$0xff] }
  0x2f   : > { %v667_v27 = vpack.i.bf16 %v260_v24, %v259_v17  ;;  %377 = vmatpush.msra.mxu0 %v356_v21  ;;  %567 = vmatpush.msra.mxu2 %v356_v21  ;;  %v652_v29 = vpack.i.bf16 %v234_v22, %v233_v14  ;;  %v298_v32 = vrot.slane %v560_v26, 1  ;;  %v277_v33 = vsel %vm221_vm0, %v275_v23, %v276_v25  ;;  %s787_s9 = smov 96   ;;  %v350_v43 = vld [vmem:[#allocation4 + $0x40] sm:$0xff]  ;;  %v349_v44 = vld [vmem:[#allocation4 + $0x38] sm:$0xff]  ;;  %v348_v45 = vld [vmem:[#allocation4 + $0x30] sm:$0xff]  ;;  %s788_s12 = smov 72  }
  0x30   : > { %648 = vrot.lane.b32.xlu0 %v647_v15, %s781_s17  ;;  %v672_v34 = vpack.i.bf16 %v277_v33, %v276_v25  ;;  %v657_v36 = vpack.i.bf16 %v920_v16, %v924_v19  ;;  %v306_v37 = vrot.slane %v559_v7, 2  ;;  %v307_v38 = vrot.slane %v560_v26, 2  ;;  %v347_v46 = vld [vmem:[#allocation4 + $0x28] sm:$0xff]  ;;  %v365_v47 = vld [vmem:[#allocation4 + $0xb8] sm:$0xff]  ;;  %v346_v48 = vld [vmem:[#allocation4 + $0x20] sm:$0xff]  ;;  %p204_p1 = scmp.lt.s32.totalorder %s828_s16, 1 }
  0x31   : > { %378 = vmatpush.msra.mxu0 %v355_v28  ;;  %568 = vmatpush.msra.mxu2 %v355_v28  ;;  %v299_v35 = vsel %vm221_vm0, %v297_v31, %v298_v32  ;;  %v364_v49 = vld [vmem:[#allocation4 + $0xb0] sm:$0xff]  ;;  %v345_v50 = vld [vmem:[#allocation4 + $0x18] sm:$0xff]  ;;  %v363_v51 = vld [vmem:[#allocation4 + $0xa8] sm:$0xff]  ;;  %vm315_vm2 = vcmask 130048   ;;  %vm318_vm3 = vcmask 261120   ;;  %vm321_vm4 = vcmask 392192  }
  0x32   : > { %v308_v39 = vsel %vm231_vm1, %v306_v37, %v307_v38  ;;  %407 = vmatpush.msra.mxu1 %v365_v47  ;;  %v344_v52 = vld [vmem:[#allocation4 + $0x10] sm:$0xff]  ;;  %v362_v53 = vld [vmem:[#allocation4 + $0xa0] sm:$0xff]  ;;  %v343_v54 = vld [vmem:[#allocation4 + $0x8] sm:$0xff]  ;;  %vm324_vm5 = vcmask 523264   ;;  %v284_v23 = vrot.slane %v920_v16, 2  ;;  %vm327_vm6 = vcmask 654336  }
  0x33   : > { %668 = vrot.lane.b32.xlu2 %v667_v27, %s784_s26  ;;  %379 = vmatpush.msra.mxu0 %v354_v30  ;;  %v361_v55 = vld [vmem:[#allocation4 + $0x98] sm:$0xff]  ;;  %v342_v56 = vld [vmem:[#allocation4] sm:$0xff]  ;;  %v360_v57 = vld [vmem:[#allocation4 + $0x90] sm:$0xff]  ;;  %v285_v24 = vrot.slane %v924_v19, 2  ;;  %vm330_vm7 = vcmask 785408   ;;  %vm333_vm8 = vcmask 916480  }
  0x34   : > { %663 = vrot.lane.b32.xlu1 %v662_v18, %s783_s25  ;;  %569 = vmatpush.msra.mxu2 %v354_v30  ;;  %v359_v58 = vld [vmem:[#allocation4 + $0x88] sm:$0xff]  ;;  %v358_v59 = vld [vmem:[#allocation4 + $0x80] sm:$0xff]  ;;  %s994_s16 = smov (!%p204_p1, %s828_s16), 1  ;;  %vm456_vm9 = vcmask 1040384   ;;  %vm458_vm10 = vcmask 1041408   ;;  %vm460_vm11 = vcmask 1042432  }
  0x35   : > { %380 = vmatpush.msra.mxu0 %v353_v40  ;;  %408 = vmatpush.msra.mxu1 %v364_v49  ;;  %v286_v16 = vsel %vm231_vm1, %v284_v23, %v285_v24  ;;  %s554_s18 = sshll.u32 %s994_s16, 3  ;;  %vm462_vm12 = vcmask 1043456   ;;  %vm464_vm13 = vcmask 1044480   ;;  %vm467_vm14 = vcmask 456704  }
  0x36   : > { %570 = vmatpush.msra.mxu2 %v353_v40  ;;  %s207_s15 = scalar_lea.vmem %s985_s3, %s554_s18 }
  0x37   : > { %381 = vmatpush.msra.mxu0 %v352_v41  ;;  %409 = vmatpush.msra.mxu1 %v363_v51 }
  0x38   : > { %653 = vrot.lane.b32.xlu0 %v652_v29, %s785_s7  ;;  %571 = vmatpush.msra.mxu2 %v352_v41 }
  0x39   : > { %382 = vmatpush.msra.mxu0 %v351_v42  ;;  %410 = vmatpush.msra.mxu1 %v362_v53 }
  0x3a   : > { %572 = vmatpush.msra.mxu2 %v351_v42 }
  0x3b   : > { %673 = vrot.lane.b32.xlu2 %v672_v34, %s786_s8  ;;  %383 = vmatpush.msra.mxu0 %v350_v43 }
  0x3c   : > { %300 = vrot.lane.b32.xlu1 %v299_v35, %s785_s7  ;;  %573 = vmatpush.msra.mxu2 %v350_v43 }
  0x3d   : > { %384 = vmatpush.msra.mxu0 %v349_v44  ;;  %411 = vmatpush.msra.mxu1 %v361_v55 }
  0x3e   : > { %574 = vmatpush.msra.mxu2 %v349_v44 }
  0x3f   : > { %385 = vmatpush.msra.mxu0 %v348_v45  ;;  %412 = vmatpush.msra.mxu1 %v360_v57 }
  0x40   : > { %658 = vrot.lane.b32.xlu0 %v657_v36, %s787_s9  ;;  %575 = vmatpush.msra.mxu2 %v348_v45 }
  0x41   : > { %386 = vmatpush.msra.mxu0 %v347_v46  ;;  %413 = vmatpush.msra.mxu1 %v359_v58 }
  0x42   : > { %576 = vmatpush.msra.mxu2 %v347_v46  ;;  %v677_v46 = vld [vmem:[%s984_s2] ss:$0 sm:$0xff] }
  0x43   : > { %302 = vrot.lane.b32.xlu2 %v298_v32, %s785_s7  ;;  %387 = vmatpush.msra.mxu0 %v346_v48 }
  0x44   : > { %293 = vrot.lane.b32.xlu1 %v560_v26, %s781_s17  ;;  %577 = vmatpush.msra.mxu2 %v346_v48 }
  0x45   : > { %388 = vmatpush.msra.mxu0 %v345_v50  ;;  %414 = vmatpush.msra.mxu1 %v358_v59 }
  0x46   : > { %578 = vmatpush.msra.mxu2 %v345_v50 }
  0x47   : > { %389 = vmatpush.msra.mxu0 %v344_v52 }
  0x48   : > { %309 = vrot.lane.b32.xlu0 %v308_v39, %s782_s21  ;;  %579 = vmatpush.msra.mxu2 %v344_v52 }
  0x49   : > { %390 = vmatpush.msra.mxu0 %v343_v54 }
  0x4a   : > { %580 = vmatpush.msra.mxu2 %v343_v54 }
  0x4b   : > { %391 = vmatpush.msra.mxu0 %v342_v56 }
  0x4c   : > { %581 = vmatpush.msra.mxu2 %v342_v56 }
  0x50   : > { %311 = vrot.lane.b32.xlu0 %v307_v38, %s782_s21 }
  0x85   : > { %v292_v60 = vpop.permute.xlu2 %291 }
  0x86   : > { %v336_v19 = vsel %vm315_vm2, %v286_v16, %v292_v60 }
  0x8d   : > { %v669_v63 = vpop.permute.xlu2 %668 }
  0x8e   : > { %v671_v21 = vunpack.i.h.bf16 %v669_v63  ;;  %v670_v22 = vunpack.i.l.bf16 %v669_v63 }
  0x95   : > { %v674_v20 = vpop.permute.xlu2 %673 }
  0x96   : > { %v676_v27 = vunpack.i.h.bf16 %v674_v20  ;;  %v675_v28 = vunpack.i.l.bf16 %v674_v20 }
  0x9d   : > { %v303_v42 = vpop.permute.xlu2 %302 }
  0x9e   : > { %v644_v61 = vpop.permute.xlu1 %643 }
  0x9f   : > { %v646_v8 = vunpack.i.h.bf16 %v644_v61  ;;  %v645_v9 = vunpack.i.l.bf16 %v644_v61 }
  0xa2   : > { %v649_v62 = vpop.permute.xlu0 %648 }
  0xa3   : > { %v651_v0 = vunpack.i.h.bf16 %v649_v62  ;;  %v650_v1 = vunpack.i.l.bf16 %v649_v62 }
  0xa5   : > { %v316_v10 = vsel %vm315_vm2, %v905_v2, %v651_v0  ;;  %v317_v11 = vsel %vm315_vm2, %v908_v5, %v650_v1 }
  0xa6   : > { %v664_v3 = vpop.permute.xlu1 %663 }
  0xa7   : > { %v666_v12 = vunpack.i.h.bf16 %v664_v3  ;;  %v665_v13 = vunpack.i.l.bf16 %v664_v3 }
  0xaa   : > { %v654_v4 = vpop.permute.xlu0 %653 }
  0xab   : > { %v656_v6 = vunpack.i.h.bf16 %v654_v4  ;;  %v655_v7 = vunpack.i.l.bf16 %v654_v4 }
  0xad   : > { %v319_v14 = vsel %vm318_vm3, %v316_v10, %v656_v6  ;;  %v320_v15 = vsel %vm318_vm3, %v317_v11, %v655_v7 }
  0xae   : > { %v322_v17 = vsel %vm321_vm4, %v319_v14, %v646_v8  ;;  %v323_v18 = vsel %vm321_vm4, %v320_v15, %v645_v9  ;;  %v301_v25 = vpop.permute.xlu1 %300 }
  0xaf   : > { %v325_v2 = vsel %vm324_vm5, %v322_v17, %v666_v12  ;;  %v326_v5 = vsel %vm324_vm5, %v323_v18, %v665_v13  ;;  %v338_v37 = vsel %vm318_vm3, %v336_v19, %v301_v25 }
  0xb0   : > { %v328_v31 = vsel %vm327_vm6, %v325_v2, %v671_v21  ;;  %v329_v32 = vsel %vm327_vm6, %v326_v5, %v670_v22 }
  0xb2   : > { %v659_v26 = vpop.permute.xlu0 %658 }
  0xb3   : > { %v661_v29 = vunpack.i.h.bf16 %v659_v26  ;;  %v660_v30 = vunpack.i.l.bf16 %v659_v26 }
  0xb5   : > { %v331_v33 = vsel %vm330_vm7, %v328_v31, %v661_v29  ;;  %v332_v34 = vsel %vm330_vm7, %v329_v32, %v660_v30 }
  0xb6   : > { %v334_v35 = vsel %vm333_vm8, %v331_v33, %v676_v27  ;;  %v335_v36 = vsel %vm333_vm8, %v332_v34, %v675_v28  ;;  %v294_v39 = vpop.permute.xlu1 %293 }
  0xb7   : > { %392 = vmatmul.f32.vlgmr.msra.gmra.mxu0 %v334_v35  ;;  %395 = vmatmul.f32.vlgmr.msra.gmra.mxu2 %v335_v36  ;;  %v337_v41 = vsel %vm315_vm2, %v285_v24, %v294_v39 }
  0xb8   : > { %v339_v43 = vsel %vm318_vm3, %v337_v41, %v303_v42 }
  0xba   : > { %v310_v38 = vpop.permute.xlu0 %309 }
  0xbb   : > { %v340_v40 = vsel %vm321_vm4, %v338_v37, %v310_v38 }
  0xbc   : > { %561 = vmatmul.msk.f32.vlgmr.msra.gmra.mxu1 %vm324_vm5, %v340_v40 }
  0xc2   : > { %v312_v44 = vpop.permute.xlu0 %311 }
  0xc3   : > { %v341_v45 = vsel %vm321_vm4, %v339_v43, %v312_v44 }
  0xc4   : > { %562 = vmatmul.msk.f32.gmra.mxu1 %vm324_vm5, %v341_v45 }
 0x134   : > { %v393_v47 = vpop.f32.mrf.mxu0 }
 0x135   : > { %v394_v48 = vadd.f32 %v677_v46, %v393_v47 }
 0x139   : > { %v416_v49 = vpop.f32.mrf.mxu1 }
 0x13a   : > { %v417_v50 = vadd.f32 %v416_v49, %v394_v48  ;;  %v396_v52 = vpop.f32.mrf.mxu2 }
 0x13b   : > { %v397_v53 = vadd.f32 %v677_v46, %v396_v52 }
 0x13c   : > { %v422_v51 = vmax.f32 %v417_v50, 0.0 }
 0x13e   : > { %426 = vrot.lane.b32.xlu1 %v422_v51, %s788_s12 }
 0x141   : > { %v419_v54 = vpop.f32.mrf.mxu1 }
 0x142   : > { %v420_v55 = vadd.f32 %v419_v54, %v397_v53 }
 0x144   : > { %v423_v56 = vmax.f32 %v420_v55, 0.0 }
 0x146   : > { %428 = vrot.lane.b32.xlu2 %v423_v56, %s788_s12 }
 0x1a0   : > { %v429_v57 = vpop.permute.xlu2 %428 }
 0x1a1   : > { %v433_v58 = vmax.f32 %v423_v56, %v429_v57 }
 0x1a3   : > { %v439_v61 = vrot.slane %v433_v58, 1 }
 0x1a5   : > { %v441_v0 = vmax.f32 %v433_v58, %v439_v61 }
 0x1a7   : > { %v450_v7 = vrot.slane %v441_v0, 4  ;;  %v452_v9 = vrot.slane %v441_v0, 5  ;;  %v454_v11 = vrot.slane %v441_v0, 6 }
 0x1b0   : > { %v427_v59 = vpop.permute.xlu1 %426 }
 0x1b1   : > { %v432_v60 = vmax.f32 %v422_v51, %v427_v59 }
 0x1b3   : > { %v435_v62 = vrot.slane %v432_v60, 1 }
 0x1b5   : > { %v437_v63 = vmax.f32 %v432_v60, %v435_v62 }
 0x1b7   : > { %v443_v1 = vrot.slane %v437_v63, 1  ;;  %v445_v3 = vrot.slane %v437_v63, 2  ;;  %v447_v4 = vrot.slane %v437_v63, 3 }
 0x1b9   : > { %v457_v6 = vsel %vm456_vm9, %v437_v63, %v443_v1 }
 0x1ba   : > { %v459_v8 = vsel %vm458_vm10, %v457_v6, %v445_v3 }
 0x1bb   : > { %v461_v10 = vsel %vm460_vm11, %v459_v8, %v447_v4 }
 0x1bc   : > { %v463_v12 = vsel %vm462_vm12, %v461_v10, %v450_v7 }
 0x1bd   : > { %v465_v13 = vsel %vm464_vm13, %v463_v12, %v452_v9 }
 0x1be   : > { %v466_v14 = vsel %vm231_vm1, %v465_v13, %v454_v11 }
 0x1bf   : > { %468 = vst.msk [vmem:[%s207_s15] sm:$0x7f] %vm467_vm14, %v466_v14 }
 0x1c0 PF: > { %p14_p4 = scmp.ge.s32.totalorder %s852_s24, 4   ;;  %s989_s12 = smov %s768_s13 }
 0x1c1   : > { %s990_s13 = smov %s772_s14  ;;  %s991_s14 = smov %s865_s29 }
 0x1c2   : > { %s992_s15 = smov %s852_s24  ;;  %16 = sbr.rel (!%p14_p4) target bundleno = 4 (0x4), region = 79 }
 0x1c7   :  { %488 = vsyncpa [#allocation3], 1 }
 0x1c8   :  { %490 = vsyncpa [#allocation3 + $0x1], 1 }
 0x1c9   :  { %491 = vsyncpa [#allocation5], 1 }

</bundles_post_ra>
